<compile_context>
chip_gen: v7x
topology: tpu7x:2x2x1
jax: 0.10.0
libtpu: 0.0.40
codegen_flags: <defaults>
</compile_context>

<pallas_src>
import jax
import jax.numpy as jnp
from jax import lax
from jax.experimental import pallas as pl
from jax.experimental.pallas import tpu as pltpu


# Layer dims of NN_mini fc1..fc5, weights stored as (in_features, out_features).
_DIMS = ((3, 4), (4, 4), (4, 4), (4, 4), (4, 2))

# Static offsets of each layer's weights / bias inside the packed param vector.
# Weights are flattened row-major: element (k, n) lives at w_off + k * N + n.
_OFFSETS = []
_off = 0
for _k, _n in _DIMS:
    _OFFSETS.append((_off, _off + _k * _n))        # (w_off, b_off)
    _off += _k * _n + _n
_NUM_PARAMS = _off                                  # 86

_R_MAX = 2048        # rows (of 128 lanes) per grid step -> 256K elems/step
_SPLIT_ROWS = 256    # force >=2 grid steps (v7x: 2 TensorCores) above this size


def _make_kernel(chunk):
    """Kernel over one (3, R, 128) input block -> (2, R, 128) output block."""

    def kernel(p_ref, x_ref, o_ref):
        # p_ref: (86,) f32 in SMEM.  x_ref: (3, R, 128) VMEM.  o_ref: (2, R, 128).
        R = x_ref.shape[1]
        n_chunks = R // chunk
        n_layers = len(_DIMS)
        # Hoist all SMEM scalar loads out of the chunk loop (loop-invariant).
        p = [p_ref[i] for i in range(_NUM_PARAMS)]

        def body(c, carry):
            r0 = pl.multiple_of(c * chunk, chunk)
            # Hidden state: list of (chunk, 128) f32 tiles (full vregs).
            h = [x_ref[k, pl.ds(r0, chunk), :] for k in range(_DIMS[0][0])]
            for layer, (K, N) in enumerate(_DIMS):
                w_off, b_off = _OFFSETS[layer]
                new_h = []
                for n in range(N):
                    # acc = b[n] + sum_k W[k, n] * h[k]   (VPU broadcast-MACs)
                    acc = h[0] * p[w_off + n] + p[b_off + n]
                    for k in range(1, K):
                        acc = acc + h[k] * p[w_off + k * N + n]
                    if layer < n_layers - 1:
                        acc = jnp.tanh(acc)          # EUP slot, overlaps VPU work
                    new_h.append(acc)
                h = new_h
            # Store each output plane directly (lane-dense, unmasked vst).
            for n in range(_DIMS[-1][1]):
                o_ref[n, pl.ds(r0, chunk), :] = h[n]
            return carry

        lax.fori_loop(0, n_chunks, body, 0)

    return kernel


def _round_up(n, m):
    return -(-n // m) * m


def pack_params(params):
    """params: list of (W, b) with W shaped (in, out). Returns (86,) f32 blob."""
    pieces = []
    for w, b in params:
        pieces.append(jnp.asarray(w, jnp.float32).reshape(-1))  # row-major k*N+n
        pieces.append(jnp.asarray(b, jnp.float32).reshape(-1))
    flat = jnp.concatenate(pieces)
    assert flat.shape == (_NUM_PARAMS,)
    return flat


def nn_mini_forward(x, params):
    """x: (B, 3). params: list of 5 (W, b) with W as (in, out).

    Returns (B, 2). Matches NN_mini.forward; the trailing .double() cast is
    value-preserving, so f64 width is applied only if the caller has enabled
    jax_enable_x64 (this module does not set the global x64 flag).
    """
    B = x.shape[0]
    if B == 0:
        out = jnp.zeros((0, 2), jnp.float32)
        return out.astype(jnp.float64) if jax.config.jax_enable_x64 else out

    rows = _round_up(B, 128) // 128                 # 128-lane rows of batch
    chunk = 16 if rows >= 16 else 8                 # in-kernel compute slice
    rows_c = _round_up(rows, chunk)

    # Grid steps: split big batches across steps (>= 2 so v7x's two TCs both
    # get work); keep each step <= _R_MAX rows so double-buffered VMEM stays
    # ~10 MiB (fits every chip's scoped-VMEM default).
    n_steps = _round_up(rows_c, _R_MAX) // _R_MAX
    if n_steps == 1 and rows_c >= _SPLIT_ROWS:
        n_steps = 2
    R = _round_up(_round_up(rows_c, n_steps) // n_steps, chunk)
    rows_pad = R * n_steps
    Bp = rows_pad * 128

    # Batch-major -> (feature, row, lane) layout; fused pad (no zeros+scatter).
    x_p = jnp.pad(jnp.asarray(x, jnp.float32), ((0, Bp - B), (0, 0)))
    x_t = x_p.reshape(rows_pad, 128, 3).transpose(2, 0, 1)    # (3, rows_pad, 128)

    flat = pack_params(params)

    out_t = pl.pallas_call(
        _make_kernel(chunk),
        out_shape=jax.ShapeDtypeStruct((2, rows_pad, 128), jnp.float32),
        grid=(n_steps,),
        in_specs=[
            pl.BlockSpec(memory_space=pltpu.MemorySpace.SMEM),     # packed params
            pl.BlockSpec((3, R, 128), lambda i: (0, i, 0)),        # x tile
        ],
        out_specs=pl.BlockSpec((2, R, 128), lambda i: (0, i, 0)),
        compiler_params=pltpu.CompilerParams(
            dimension_semantics=("parallel",)),
    )(flat, x_t)

    out = out_t.transpose(1, 2, 0).reshape(Bp, 2)[:B]          # back to (B, 2)
    if jax.config.jax_enable_x64:
        out = out.astype(jnp.float64)                          # PyTorch's .double()
    return out


def init_params(key):
    """Deterministic init mimicking torch.nn.Linear default U(-1/sqrt(fan_in), +)."""
    params = []
    for (fan_in, fan_out) in _DIMS:
        key, kw, kb = jax.random.split(key, 3)
        bound = 1.0 / (fan_in ** 0.5)
        w = jax.random.uniform(kw, (fan_in, fan_out), jnp.float32, -bound, bound)
        b = jax.random.uniform(kb, (fan_out,), jnp.float32, -bound, bound)
        params.append((w, b))
    return params
    # NOTE: nn.Dropout(0.5) is defined in __init__ but never used in forward,
    # so it is intentionally omitted (and would be identity in eval mode anyway).


def _reference(x, params):
    """Plain-JAX reference (same f32 math; dropout unused in forward)."""
    h = jnp.asarray(x, jnp.float32)
    for i, (w, b) in enumerate(params):
        h = h @ w + b
        if i < len(params) - 1:
            h = jnp.tanh(h)
    return h


if __name__ == "__main__":
    key = jax.random.PRNGKey(0)
    key_x1, key_x2, key_p = jax.random.split(key, 3)
    params = init_params(key_p)

    ok = True
    # Small batch (single row / single chunk path).
    B1 = 8
    x1 = jax.random.normal(key_x1, (B1, 3), dtype=jnp.float32)
    out1 = nn_mini_forward(x1, params)
    jax.block_until_ready(out1)
    ok &= out1.shape == (B1, 2)
    ok &= bool(jnp.allclose(out1.astype(jnp.float32), _reference(x1, params),
                            atol=1e-4, rtol=1e-4))

    # Slightly larger batch to exercise the in-kernel chunk loop.
    B2 = 2500
    x2 = jax.random.normal(key_x2, (B2, 3), dtype=jnp.float32)
    out2 = nn_mini_forward(x2, params)
    jax.block_until_ready(out2)
    ok &= out2.shape == (B2, 2)
    ok &= bool(jnp.allclose(out2.astype(jnp.float32), _reference(x2, params),
                            atol=1e-4, rtol=1e-4))

    assert ok, "mismatch vs reference"
    print("KERNEL_OK")
</pallas_src>

<mosaic_0001>
module attributes {stable_mosaic.version = 11 : i64} {
  func.func @kernel(%arg0: i32, %arg1: memref<86xf32, #tpu.memory_space<smem>>, %arg2: memref<3x8x128xf32, #tpu.memory_space<vmem>>, %arg3: memref<2x8x128xf32, #tpu.memory_space<vmem>>) attributes {dimension_semantics = [#tpu.dimension_semantics<parallel>], iteration_bounds = array<i64: 1>, scalar_prefetch = 0 : i64, scratch_operands = 0 : i64, tpu.core_type = #tpu.core_type<tc>, window_params = [{transform_indices = @transform_0, window_bounds = array<i64: 86>}, {transform_indices = @transform_1, window_bounds = array<i64: 3, 8, 128>}, {transform_indices = @transform_2, window_bounds = array<i64: 2, 8, 128>}]} {
    %c0 = arith.constant 0 : index
    %0 = memref.load %arg1[%c0] : memref<86xf32, #tpu.memory_space<smem>>
    %c1 = arith.constant 1 : index
    %1 = memref.load %arg1[%c1] : memref<86xf32, #tpu.memory_space<smem>>
    %c2 = arith.constant 2 : index
    %2 = memref.load %arg1[%c2] : memref<86xf32, #tpu.memory_space<smem>>
    %c3 = arith.constant 3 : index
    %3 = memref.load %arg1[%c3] : memref<86xf32, #tpu.memory_space<smem>>
    %c4 = arith.constant 4 : index
    %4 = memref.load %arg1[%c4] : memref<86xf32, #tpu.memory_space<smem>>
    %c5 = arith.constant 5 : index
    %5 = memref.load %arg1[%c5] : memref<86xf32, #tpu.memory_space<smem>>
    %c6 = arith.constant 6 : index
    %6 = memref.load %arg1[%c6] : memref<86xf32, #tpu.memory_space<smem>>
    %c7 = arith.constant 7 : index
    %7 = memref.load %arg1[%c7] : memref<86xf32, #tpu.memory_space<smem>>
    %c8 = arith.constant 8 : index
    %8 = memref.load %arg1[%c8] : memref<86xf32, #tpu.memory_space<smem>>
    %c9 = arith.constant 9 : index
    %9 = memref.load %arg1[%c9] : memref<86xf32, #tpu.memory_space<smem>>
    %c10 = arith.constant 10 : index
    %10 = memref.load %arg1[%c10] : memref<86xf32, #tpu.memory_space<smem>>
    %c11 = arith.constant 11 : index
    %11 = memref.load %arg1[%c11] : memref<86xf32, #tpu.memory_space<smem>>
    %c12 = arith.constant 12 : index
    %12 = memref.load %arg1[%c12] : memref<86xf32, #tpu.memory_space<smem>>
    %c13 = arith.constant 13 : index
    %13 = memref.load %arg1[%c13] : memref<86xf32, #tpu.memory_space<smem>>
    %c14 = arith.constant 14 : index
    %14 = memref.load %arg1[%c14] : memref<86xf32, #tpu.memory_space<smem>>
    %c15 = arith.constant 15 : index
    %15 = memref.load %arg1[%c15] : memref<86xf32, #tpu.memory_space<smem>>
    %c16 = arith.constant 16 : index
    %16 = memref.load %arg1[%c16] : memref<86xf32, #tpu.memory_space<smem>>
    %c17 = arith.constant 17 : index
    %17 = memref.load %arg1[%c17] : memref<86xf32, #tpu.memory_space<smem>>
    %c18 = arith.constant 18 : index
    %18 = memref.load %arg1[%c18] : memref<86xf32, #tpu.memory_space<smem>>
    %c19 = arith.constant 19 : index
    %19 = memref.load %arg1[%c19] : memref<86xf32, #tpu.memory_space<smem>>
    %c20 = arith.constant 20 : index
    %20 = memref.load %arg1[%c20] : memref<86xf32, #tpu.memory_space<smem>>
    %c21 = arith.constant 21 : index
    %21 = memref.load %arg1[%c21] : memref<86xf32, #tpu.memory_space<smem>>
    %c22 = arith.constant 22 : index
    %22 = memref.load %arg1[%c22] : memref<86xf32, #tpu.memory_space<smem>>
    %c23 = arith.constant 23 : index
    %23 = memref.load %arg1[%c23] : memref<86xf32, #tpu.memory_space<smem>>
    %c24 = arith.constant 24 : index
    %24 = memref.load %arg1[%c24] : memref<86xf32, #tpu.memory_space<smem>>
    %c25 = arith.constant 25 : index
    %25 = memref.load %arg1[%c25] : memref<86xf32, #tpu.memory_space<smem>>
    %c26 = arith.constant 26 : index
    %26 = memref.load %arg1[%c26] : memref<86xf32, #tpu.memory_space<smem>>
    %c27 = arith.constant 27 : index
    %27 = memref.load %arg1[%c27] : memref<86xf32, #tpu.memory_space<smem>>
    %c28 = arith.constant 28 : index
    %28 = memref.load %arg1[%c28] : memref<86xf32, #tpu.memory_space<smem>>
    %c29 = arith.constant 29 : index
    %29 = memref.load %arg1[%c29] : memref<86xf32, #tpu.memory_space<smem>>
    %c30 = arith.constant 30 : index
    %30 = memref.load %arg1[%c30] : memref<86xf32, #tpu.memory_space<smem>>
    %c31 = arith.constant 31 : index
    %31 = memref.load %arg1[%c31] : memref<86xf32, #tpu.memory_space<smem>>
    %c32 = arith.constant 32 : index
    %32 = memref.load %arg1[%c32] : memref<86xf32, #tpu.memory_space<smem>>
    %c33 = arith.constant 33 : index
    %33 = memref.load %arg1[%c33] : memref<86xf32, #tpu.memory_space<smem>>
    %c34 = arith.constant 34 : index
    %34 = memref.load %arg1[%c34] : memref<86xf32, #tpu.memory_space<smem>>
    %c35 = arith.constant 35 : index
    %35 = memref.load %arg1[%c35] : memref<86xf32, #tpu.memory_space<smem>>
    %c36 = arith.constant 36 : index
    %36 = memref.load %arg1[%c36] : memref<86xf32, #tpu.memory_space<smem>>
    %c37 = arith.constant 37 : index
    %37 = memref.load %arg1[%c37] : memref<86xf32, #tpu.memory_space<smem>>
    %c38 = arith.constant 38 : index
    %38 = memref.load %arg1[%c38] : memref<86xf32, #tpu.memory_space<smem>>
    %c39 = arith.constant 39 : index
    %39 = memref.load %arg1[%c39] : memref<86xf32, #tpu.memory_space<smem>>
    %c40 = arith.constant 40 : index
    %40 = memref.load %arg1[%c40] : memref<86xf32, #tpu.memory_space<smem>>
    %c41 = arith.constant 41 : index
    %41 = memref.load %arg1[%c41] : memref<86xf32, #tpu.memory_space<smem>>
    %c42 = arith.constant 42 : index
    %42 = memref.load %arg1[%c42] : memref<86xf32, #tpu.memory_space<smem>>
    %c43 = arith.constant 43 : index
    %43 = memref.load %arg1[%c43] : memref<86xf32, #tpu.memory_space<smem>>
    %c44 = arith.constant 44 : index
    %44 = memref.load %arg1[%c44] : memref<86xf32, #tpu.memory_space<smem>>
    %c45 = arith.constant 45 : index
    %45 = memref.load %arg1[%c45] : memref<86xf32, #tpu.memory_space<smem>>
    %c46 = arith.constant 46 : index
    %46 = memref.load %arg1[%c46] : memref<86xf32, #tpu.memory_space<smem>>
    %c47 = arith.constant 47 : index
    %47 = memref.load %arg1[%c47] : memref<86xf32, #tpu.memory_space<smem>>
    %c48 = arith.constant 48 : index
    %48 = memref.load %arg1[%c48] : memref<86xf32, #tpu.memory_space<smem>>
    %c49 = arith.constant 49 : index
    %49 = memref.load %arg1[%c49] : memref<86xf32, #tpu.memory_space<smem>>
    %c50 = arith.constant 50 : index
    %50 = memref.load %arg1[%c50] : memref<86xf32, #tpu.memory_space<smem>>
    %c51 = arith.constant 51 : index
    %51 = memref.load %arg1[%c51] : memref<86xf32, #tpu.memory_space<smem>>
    %c52 = arith.constant 52 : index
    %52 = memref.load %arg1[%c52] : memref<86xf32, #tpu.memory_space<smem>>
    %c53 = arith.constant 53 : index
    %53 = memref.load %arg1[%c53] : memref<86xf32, #tpu.memory_space<smem>>
    %c54 = arith.constant 54 : index
    %54 = memref.load %arg1[%c54] : memref<86xf32, #tpu.memory_space<smem>>
    %c55 = arith.constant 55 : index
    %55 = memref.load %arg1[%c55] : memref<86xf32, #tpu.memory_space<smem>>
    %c56 = arith.constant 56 : index
    %56 = memref.load %arg1[%c56] : memref<86xf32, #tpu.memory_space<smem>>
    %c57 = arith.constant 57 : index
    %57 = memref.load %arg1[%c57] : memref<86xf32, #tpu.memory_space<smem>>
    %c58 = arith.constant 58 : index
    %58 = memref.load %arg1[%c58] : memref<86xf32, #tpu.memory_space<smem>>
    %c59 = arith.constant 59 : index
    %59 = memref.load %arg1[%c59] : memref<86xf32, #tpu.memory_space<smem>>
    %c60 = arith.constant 60 : index
    %60 = memref.load %arg1[%c60] : memref<86xf32, #tpu.memory_space<smem>>
    %c61 = arith.constant 61 : index
    %61 = memref.load %arg1[%c61] : memref<86xf32, #tpu.memory_space<smem>>
    %c62 = arith.constant 62 : index
    %62 = memref.load %arg1[%c62] : memref<86xf32, #tpu.memory_space<smem>>
    %c63 = arith.constant 63 : index
    %63 = memref.load %arg1[%c63] : memref<86xf32, #tpu.memory_space<smem>>
    %c64 = arith.constant 64 : index
    %64 = memref.load %arg1[%c64] : memref<86xf32, #tpu.memory_space<smem>>
    %c65 = arith.constant 65 : index
    %65 = memref.load %arg1[%c65] : memref<86xf32, #tpu.memory_space<smem>>
    %c66 = arith.constant 66 : index
    %66 = memref.load %arg1[%c66] : memref<86xf32, #tpu.memory_space<smem>>
    %c67 = arith.constant 67 : index
    %67 = memref.load %arg1[%c67] : memref<86xf32, #tpu.memory_space<smem>>
    %c68 = arith.constant 68 : index
    %68 = memref.load %arg1[%c68] : memref<86xf32, #tpu.memory_space<smem>>
    %c69 = arith.constant 69 : index
    %69 = memref.load %arg1[%c69] : memref<86xf32, #tpu.memory_space<smem>>
    %c70 = arith.constant 70 : index
    %70 = memref.load %arg1[%c70] : memref<86xf32, #tpu.memory_space<smem>>
    %c71 = arith.constant 71 : index
    %71 = memref.load %arg1[%c71] : memref<86xf32, #tpu.memory_space<smem>>
    %c72 = arith.constant 72 : index
    %72 = memref.load %arg1[%c72] : memref<86xf32, #tpu.memory_space<smem>>
    %c73 = arith.constant 73 : index
    %73 = memref.load %arg1[%c73] : memref<86xf32, #tpu.memory_space<smem>>
    %c74 = arith.constant 74 : index
    %74 = memref.load %arg1[%c74] : memref<86xf32, #tpu.memory_space<smem>>
    %c75 = arith.constant 75 : index
    %75 = memref.load %arg1[%c75] : memref<86xf32, #tpu.memory_space<smem>>
    %c76 = arith.constant 76 : index
    %76 = memref.load %arg1[%c76] : memref<86xf32, #tpu.memory_space<smem>>
    %c77 = arith.constant 77 : index
    %77 = memref.load %arg1[%c77] : memref<86xf32, #tpu.memory_space<smem>>
    %c78 = arith.constant 78 : index
    %78 = memref.load %arg1[%c78] : memref<86xf32, #tpu.memory_space<smem>>
    %c79 = arith.constant 79 : index
    %79 = memref.load %arg1[%c79] : memref<86xf32, #tpu.memory_space<smem>>
    %c80 = arith.constant 80 : index
    %80 = memref.load %arg1[%c80] : memref<86xf32, #tpu.memory_space<smem>>
    %c81 = arith.constant 81 : index
    %81 = memref.load %arg1[%c81] : memref<86xf32, #tpu.memory_space<smem>>
    %c82 = arith.constant 82 : index
    %82 = memref.load %arg1[%c82] : memref<86xf32, #tpu.memory_space<smem>>
    %c83 = arith.constant 83 : index
    %83 = memref.load %arg1[%c83] : memref<86xf32, #tpu.memory_space<smem>>
    %c84 = arith.constant 84 : index
    %84 = memref.load %arg1[%c84] : memref<86xf32, #tpu.memory_space<smem>>
    %c85 = arith.constant 85 : index
    %85 = memref.load %arg1[%c85] : memref<86xf32, #tpu.memory_space<smem>>
    %c0_i32 = arith.constant 0 : i32
    %c8_i32 = arith.constant 8 : i32
    %86 = arith.muli %c0_i32, %c8_i32 : i32
    %87 = tpu.assume_multiple %86, 8 : i32
    %c0_0 = arith.constant 0 : index
    %88 = arith.index_cast %87 : i32 to index
    %c0_1 = arith.constant 0 : index
    %89 = vector.load %arg2[%c0_0, %88, %c0_1] : memref<3x8x128xf32, #tpu.memory_space<vmem>>, vector<1x8x128xf32>
    %90 = vector.shape_cast %89 : vector<1x8x128xf32> to vector<8x128xf32>
    %c1_2 = arith.constant 1 : index
    %91 = arith.index_cast %87 : i32 to index
    %c0_3 = arith.constant 0 : index
    %92 = vector.load %arg2[%c1_2, %91, %c0_3] : memref<3x8x128xf32, #tpu.memory_space<vmem>>, vector<1x8x128xf32>
    %93 = vector.shape_cast %92 : vector<1x8x128xf32> to vector<8x128xf32>
    %c2_4 = arith.constant 2 : index
    %94 = arith.index_cast %87 : i32 to index
    %c0_5 = arith.constant 0 : index
    %95 = vector.load %arg2[%c2_4, %94, %c0_5] : memref<3x8x128xf32, #tpu.memory_space<vmem>>, vector<1x8x128xf32>
    %96 = vector.shape_cast %95 : vector<1x8x128xf32> to vector<8x128xf32>
    %97 = vector.broadcast %0 : f32 to vector<8x128xf32>
    %98 = arith.mulf %90, %97 : vector<8x128xf32>
    %99 = vector.broadcast %12 : f32 to vector<8x128xf32>
    %100 = arith.addf %98, %99 : vector<8x128xf32>
    %101 = vector.broadcast %4 : f32 to vector<8x128xf32>
    %102 = arith.mulf %93, %101 : vector<8x128xf32>
    %103 = arith.addf %100, %102 : vector<8x128xf32>
    %104 = vector.broadcast %8 : f32 to vector<8x128xf32>
    %105 = arith.mulf %96, %104 : vector<8x128xf32>
    %106 = arith.addf %103, %105 : vector<8x128xf32>
    %107 = math.tanh %106 : vector<8x128xf32>
    %108 = vector.broadcast %1 : f32 to vector<8x128xf32>
    %109 = arith.mulf %90, %108 : vector<8x128xf32>
    %110 = vector.broadcast %13 : f32 to vector<8x128xf32>
    %111 = arith.addf %109, %110 : vector<8x128xf32>
    %112 = vector.broadcast %5 : f32 to vector<8x128xf32>
    %113 = arith.mulf %93, %112 : vector<8x128xf32>
    %114 = arith.addf %111, %113 : vector<8x128xf32>
    %115 = vector.broadcast %9 : f32 to vector<8x128xf32>
    %116 = arith.mulf %96, %115 : vector<8x128xf32>
    %117 = arith.addf %114, %116 : vector<8x128xf32>
    %118 = math.tanh %117 : vector<8x128xf32>
    %119 = vector.broadcast %2 : f32 to vector<8x128xf32>
    %120 = arith.mulf %90, %119 : vector<8x128xf32>
    %121 = vector.broadcast %14 : f32 to vector<8x128xf32>
    %122 = arith.addf %120, %121 : vector<8x128xf32>
    %123 = vector.broadcast %6 : f32 to vector<8x128xf32>
    %124 = arith.mulf %93, %123 : vector<8x128xf32>
    %125 = arith.addf %122, %124 : vector<8x128xf32>
    %126 = vector.broadcast %10 : f32 to vector<8x128xf32>
    %127 = arith.mulf %96, %126 : vector<8x128xf32>
    %128 = arith.addf %125, %127 : vector<8x128xf32>
    %129 = math.tanh %128 : vector<8x128xf32>
    %130 = vector.broadcast %3 : f32 to vector<8x128xf32>
    %131 = arith.mulf %90, %130 : vector<8x128xf32>
    %132 = vector.broadcast %15 : f32 to vector<8x128xf32>
    %133 = arith.addf %131, %132 : vector<8x128xf32>
    %134 = vector.broadcast %7 : f32 to vector<8x128xf32>
    %135 = arith.mulf %93, %134 : vector<8x128xf32>
    %136 = arith.addf %133, %135 : vector<8x128xf32>
    %137 = vector.broadcast %11 : f32 to vector<8x128xf32>
    %138 = arith.mulf %96, %137 : vector<8x128xf32>
    %139 = arith.addf %136, %138 : vector<8x128xf32>
    %140 = math.tanh %139 : vector<8x128xf32>
    %141 = vector.broadcast %16 : f32 to vector<8x128xf32>
    %142 = arith.mulf %107, %141 : vector<8x128xf32>
    %143 = vector.broadcast %32 : f32 to vector<8x128xf32>
    %144 = arith.addf %142, %143 : vector<8x128xf32>
    %145 = vector.broadcast %20 : f32 to vector<8x128xf32>
    %146 = arith.mulf %118, %145 : vector<8x128xf32>
    %147 = arith.addf %144, %146 : vector<8x128xf32>
    %148 = vector.broadcast %24 : f32 to vector<8x128xf32>
    %149 = arith.mulf %129, %148 : vector<8x128xf32>
    %150 = arith.addf %147, %149 : vector<8x128xf32>
    %151 = vector.broadcast %28 : f32 to vector<8x128xf32>
    %152 = arith.mulf %140, %151 : vector<8x128xf32>
    %153 = arith.addf %150, %152 : vector<8x128xf32>
    %154 = math.tanh %153 : vector<8x128xf32>
    %155 = vector.broadcast %17 : f32 to vector<8x128xf32>
    %156 = arith.mulf %107, %155 : vector<8x128xf32>
    %157 = vector.broadcast %33 : f32 to vector<8x128xf32>
    %158 = arith.addf %156, %157 : vector<8x128xf32>
    %159 = vector.broadcast %21 : f32 to vector<8x128xf32>
    %160 = arith.mulf %118, %159 : vector<8x128xf32>
    %161 = arith.addf %158, %160 : vector<8x128xf32>
    %162 = vector.broadcast %25 : f32 to vector<8x128xf32>
    %163 = arith.mulf %129, %162 : vector<8x128xf32>
    %164 = arith.addf %161, %163 : vector<8x128xf32>
    %165 = vector.broadcast %29 : f32 to vector<8x128xf32>
    %166 = arith.mulf %140, %165 : vector<8x128xf32>
    %167 = arith.addf %164, %166 : vector<8x128xf32>
    %168 = math.tanh %167 : vector<8x128xf32>
    %169 = vector.broadcast %18 : f32 to vector<8x128xf32>
    %170 = arith.mulf %107, %169 : vector<8x128xf32>
    %171 = vector.broadcast %34 : f32 to vector<8x128xf32>
    %172 = arith.addf %170, %171 : vector<8x128xf32>
    %173 = vector.broadcast %22 : f32 to vector<8x128xf32>
    %174 = arith.mulf %118, %173 : vector<8x128xf32>
    %175 = arith.addf %172, %174 : vector<8x128xf32>
    %176 = vector.broadcast %26 : f32 to vector<8x128xf32>
    %177 = arith.mulf %129, %176 : vector<8x128xf32>
    %178 = arith.addf %175, %177 : vector<8x128xf32>
    %179 = vector.broadcast %30 : f32 to vector<8x128xf32>
    %180 = arith.mulf %140, %179 : vector<8x128xf32>
    %181 = arith.addf %178, %180 : vector<8x128xf32>
    %182 = math.tanh %181 : vector<8x128xf32>
    %183 = vector.broadcast %19 : f32 to vector<8x128xf32>
    %184 = arith.mulf %107, %183 : vector<8x128xf32>
    %185 = vector.broadcast %35 : f32 to vector<8x128xf32>
    %186 = arith.addf %184, %185 : vector<8x128xf32>
    %187 = vector.broadcast %23 : f32 to vector<8x128xf32>
    %188 = arith.mulf %118, %187 : vector<8x128xf32>
    %189 = arith.addf %186, %188 : vector<8x128xf32>
    %190 = vector.broadcast %27 : f32 to vector<8x128xf32>
    %191 = arith.mulf %129, %190 : vector<8x128xf32>
    %192 = arith.addf %189, %191 : vector<8x128xf32>
    %193 = vector.broadcast %31 : f32 to vector<8x128xf32>
    %194 = arith.mulf %140, %193 : vector<8x128xf32>
    %195 = arith.addf %192, %194 : vector<8x128xf32>
    %196 = math.tanh %195 : vector<8x128xf32>
    %197 = vector.broadcast %36 : f32 to vector<8x128xf32>
    %198 = arith.mulf %154, %197 : vector<8x128xf32>
    %199 = vector.broadcast %52 : f32 to vector<8x128xf32>
    %200 = arith.addf %198, %199 : vector<8x128xf32>
    %201 = vector.broadcast %40 : f32 to vector<8x128xf32>
    %202 = arith.mulf %168, %201 : vector<8x128xf32>
    %203 = arith.addf %200, %202 : vector<8x128xf32>
    %204 = vector.broadcast %44 : f32 to vector<8x128xf32>
    %205 = arith.mulf %182, %204 : vector<8x128xf32>
    %206 = arith.addf %203, %205 : vector<8x128xf32>
    %207 = vector.broadcast %48 : f32 to vector<8x128xf32>
    %208 = arith.mulf %196, %207 : vector<8x128xf32>
    %209 = arith.addf %206, %208 : vector<8x128xf32>
    %210 = math.tanh %209 : vector<8x128xf32>
    %211 = vector.broadcast %37 : f32 to vector<8x128xf32>
    %212 = arith.mulf %154, %211 : vector<8x128xf32>
    %213 = vector.broadcast %53 : f32 to vector<8x128xf32>
    %214 = arith.addf %212, %213 : vector<8x128xf32>
    %215 = vector.broadcast %41 : f32 to vector<8x128xf32>
    %216 = arith.mulf %168, %215 : vector<8x128xf32>
    %217 = arith.addf %214, %216 : vector<8x128xf32>
    %218 = vector.broadcast %45 : f32 to vector<8x128xf32>
    %219 = arith.mulf %182, %218 : vector<8x128xf32>
    %220 = arith.addf %217, %219 : vector<8x128xf32>
    %221 = vector.broadcast %49 : f32 to vector<8x128xf32>
    %222 = arith.mulf %196, %221 : vector<8x128xf32>
    %223 = arith.addf %220, %222 : vector<8x128xf32>
    %224 = math.tanh %223 : vector<8x128xf32>
    %225 = vector.broadcast %38 : f32 to vector<8x128xf32>
    %226 = arith.mulf %154, %225 : vector<8x128xf32>
    %227 = vector.broadcast %54 : f32 to vector<8x128xf32>
    %228 = arith.addf %226, %227 : vector<8x128xf32>
    %229 = vector.broadcast %42 : f32 to vector<8x128xf32>
    %230 = arith.mulf %168, %229 : vector<8x128xf32>
    %231 = arith.addf %228, %230 : vector<8x128xf32>
    %232 = vector.broadcast %46 : f32 to vector<8x128xf32>
    %233 = arith.mulf %182, %232 : vector<8x128xf32>
    %234 = arith.addf %231, %233 : vector<8x128xf32>
    %235 = vector.broadcast %50 : f32 to vector<8x128xf32>
    %236 = arith.mulf %196, %235 : vector<8x128xf32>
    %237 = arith.addf %234, %236 : vector<8x128xf32>
    %238 = math.tanh %237 : vector<8x128xf32>
    %239 = vector.broadcast %39 : f32 to vector<8x128xf32>
    %240 = arith.mulf %154, %239 : vector<8x128xf32>
    %241 = vector.broadcast %55 : f32 to vector<8x128xf32>
    %242 = arith.addf %240, %241 : vector<8x128xf32>
    %243 = vector.broadcast %43 : f32 to vector<8x128xf32>
    %244 = arith.mulf %168, %243 : vector<8x128xf32>
    %245 = arith.addf %242, %244 : vector<8x128xf32>
    %246 = vector.broadcast %47 : f32 to vector<8x128xf32>
    %247 = arith.mulf %182, %246 : vector<8x128xf32>
    %248 = arith.addf %245, %247 : vector<8x128xf32>
    %249 = vector.broadcast %51 : f32 to vector<8x128xf32>
    %250 = arith.mulf %196, %249 : vector<8x128xf32>
    %251 = arith.addf %248, %250 : vector<8x128xf32>
    %252 = math.tanh %251 : vector<8x128xf32>
    %253 = vector.broadcast %56 : f32 to vector<8x128xf32>
    %254 = arith.mulf %210, %253 : vector<8x128xf32>
    %255 = vector.broadcast %72 : f32 to vector<8x128xf32>
    %256 = arith.addf %254, %255 : vector<8x128xf32>
    %257 = vector.broadcast %60 : f32 to vector<8x128xf32>
    %258 = arith.mulf %224, %257 : vector<8x128xf32>
    %259 = arith.addf %256, %258 : vector<8x128xf32>
    %260 = vector.broadcast %64 : f32 to vector<8x128xf32>
    %261 = arith.mulf %238, %260 : vector<8x128xf32>
    %262 = arith.addf %259, %261 : vector<8x128xf32>
    %263 = vector.broadcast %68 : f32 to vector<8x128xf32>
    %264 = arith.mulf %252, %263 : vector<8x128xf32>
    %265 = arith.addf %262, %264 : vector<8x128xf32>
    %266 = math.tanh %265 : vector<8x128xf32>
    %267 = vector.broadcast %57 : f32 to vector<8x128xf32>
    %268 = arith.mulf %210, %267 : vector<8x128xf32>
    %269 = vector.broadcast %73 : f32 to vector<8x128xf32>
    %270 = arith.addf %268, %269 : vector<8x128xf32>
    %271 = vector.broadcast %61 : f32 to vector<8x128xf32>
    %272 = arith.mulf %224, %271 : vector<8x128xf32>
    %273 = arith.addf %270, %272 : vector<8x128xf32>
    %274 = vector.broadcast %65 : f32 to vector<8x128xf32>
    %275 = arith.mulf %238, %274 : vector<8x128xf32>
    %276 = arith.addf %273, %275 : vector<8x128xf32>
    %277 = vector.broadcast %69 : f32 to vector<8x128xf32>
    %278 = arith.mulf %252, %277 : vector<8x128xf32>
    %279 = arith.addf %276, %278 : vector<8x128xf32>
    %280 = math.tanh %279 : vector<8x128xf32>
    %281 = vector.broadcast %58 : f32 to vector<8x128xf32>
    %282 = arith.mulf %210, %281 : vector<8x128xf32>
    %283 = vector.broadcast %74 : f32 to vector<8x128xf32>
    %284 = arith.addf %282, %283 : vector<8x128xf32>
    %285 = vector.broadcast %62 : f32 to vector<8x128xf32>
    %286 = arith.mulf %224, %285 : vector<8x128xf32>
    %287 = arith.addf %284, %286 : vector<8x128xf32>
    %288 = vector.broadcast %66 : f32 to vector<8x128xf32>
    %289 = arith.mulf %238, %288 : vector<8x128xf32>
    %290 = arith.addf %287, %289 : vector<8x128xf32>
    %291 = vector.broadcast %70 : f32 to vector<8x128xf32>
    %292 = arith.mulf %252, %291 : vector<8x128xf32>
    %293 = arith.addf %290, %292 : vector<8x128xf32>
    %294 = math.tanh %293 : vector<8x128xf32>
    %295 = vector.broadcast %59 : f32 to vector<8x128xf32>
    %296 = arith.mulf %210, %295 : vector<8x128xf32>
    %297 = vector.broadcast %75 : f32 to vector<8x128xf32>
    %298 = arith.addf %296, %297 : vector<8x128xf32>
    %299 = vector.broadcast %63 : f32 to vector<8x128xf32>
    %300 = arith.mulf %224, %299 : vector<8x128xf32>
    %301 = arith.addf %298, %300 : vector<8x128xf32>
    %302 = vector.broadcast %67 : f32 to vector<8x128xf32>
    %303 = arith.mulf %238, %302 : vector<8x128xf32>
    %304 = arith.addf %301, %303 : vector<8x128xf32>
    %305 = vector.broadcast %71 : f32 to vector<8x128xf32>
    %306 = arith.mulf %252, %305 : vector<8x128xf32>
    %307 = arith.addf %304, %306 : vector<8x128xf32>
    %308 = math.tanh %307 : vector<8x128xf32>
    %309 = vector.broadcast %76 : f32 to vector<8x128xf32>
    %310 = arith.mulf %266, %309 : vector<8x128xf32>
    %311 = vector.broadcast %84 : f32 to vector<8x128xf32>
    %312 = arith.addf %310, %311 : vector<8x128xf32>
    %313 = vector.broadcast %78 : f32 to vector<8x128xf32>
    %314 = arith.mulf %280, %313 : vector<8x128xf32>
    %315 = arith.addf %312, %314 : vector<8x128xf32>
    %316 = vector.broadcast %80 : f32 to vector<8x128xf32>
    %317 = arith.mulf %294, %316 : vector<8x128xf32>
    %318 = arith.addf %315, %317 : vector<8x128xf32>
    %319 = vector.broadcast %82 : f32 to vector<8x128xf32>
    %320 = arith.mulf %308, %319 : vector<8x128xf32>
    %321 = arith.addf %318, %320 : vector<8x128xf32>
    %322 = vector.broadcast %77 : f32 to vector<8x128xf32>
    %323 = arith.mulf %266, %322 : vector<8x128xf32>
    %324 = vector.broadcast %85 : f32 to vector<8x128xf32>
    %325 = arith.addf %323, %324 : vector<8x128xf32>
    %326 = vector.broadcast %79 : f32 to vector<8x128xf32>
    %327 = arith.mulf %280, %326 : vector<8x128xf32>
    %328 = arith.addf %325, %327 : vector<8x128xf32>
    %329 = vector.broadcast %81 : f32 to vector<8x128xf32>
    %330 = arith.mulf %294, %329 : vector<8x128xf32>
    %331 = arith.addf %328, %330 : vector<8x128xf32>
    %332 = vector.broadcast %83 : f32 to vector<8x128xf32>
    %333 = arith.mulf %308, %332 : vector<8x128xf32>
    %334 = arith.addf %331, %333 : vector<8x128xf32>
    %c0_6 = arith.constant 0 : index
    %335 = arith.index_cast %87 : i32 to index
    %c0_7 = arith.constant 0 : index
    %336 = vector.load %arg3[%c0_6, %335, %c0_7] : memref<2x8x128xf32, #tpu.memory_space<vmem>>, vector<1x8x128xf32>
    %337 = vector.shape_cast %336 : vector<1x8x128xf32> to vector<8x128xf32>
    %338 = vector.shape_cast %321 : vector<8x128xf32> to vector<1x8x128xf32>
    tpu.vector_store %arg3[%c0_6, %335, %c0_7], %338 {strides = array<i32>} : memref<2x8x128xf32, #tpu.memory_space<vmem>>, vector<1x8x128xf32>,
    %c1_8 = arith.constant 1 : index
    %339 = arith.index_cast %87 : i32 to index
    %c0_9 = arith.constant 0 : index
    %340 = vector.load %arg3[%c1_8, %339, %c0_9] : memref<2x8x128xf32, #tpu.memory_space<vmem>>, vector<1x8x128xf32>
    %341 = vector.shape_cast %340 : vector<1x8x128xf32> to vector<8x128xf32>
    %342 = vector.shape_cast %334 : vector<8x128xf32> to vector<1x8x128xf32>
    tpu.vector_store %arg3[%c1_8, %339, %c0_9], %342 {strides = array<i32>} : memref<2x8x128xf32, #tpu.memory_space<vmem>>, vector<1x8x128xf32>,
    %c1_i32 = arith.constant 1 : i32
    return
  }
  func.func @transform_0(%arg0: i32) -> i32 {
    %c0_i32 = arith.constant 0 : i32
    %c0_i32_0 = arith.constant 0 : i32
    return %c0_i32 : i32
  }
  func.func @transform_1(%arg0: i32) -> (i32, i32, i32) {
    %c0_i32 = arith.constant 0 : i32
    %c0_i32_0 = arith.constant 0 : i32
    %c0_i32_1 = arith.constant 0 : i32
    return %c0_i32, %arg0, %c0_i32_0 : i32, i32, i32
  }
  func.func @transform_2(%arg0: i32) -> (i32, i32, i32) {
    %c0_i32 = arith.constant 0 : i32
    %c0_i32_0 = arith.constant 0 : i32
    %c0_i32_1 = arith.constant 0 : i32
    return %c0_i32, %arg0, %c0_i32_0 : i32, i32, i32
  }
}

</mosaic_0001>

<bundles_post_ra>
// kernel: tpu_custom_call.1
= control target key start
LH: loop header
LB: loop body
LE: loop exit
PB: predicated region body
PF: predicated region fallthrough
CT: control target
= control target key end

     0   :  { %7 = vsyncpa [#allocation5], 0  ;;  %s843_s0 = inlined_call_operand.hbm [shape: f32[86], index: 0, kind: input, shape index: {}]   ;;  %s844_s1 = inlined_call_operand.hbm [shape: f32[3,8,128], index: 1, kind: input, shape index: {}]   ;;  %s845_s2 = inlined_call_operand.hbm [shape: f32[2,8,128], index: 2, kind: output, shape index: {}]  }
   0x1   :  { %8 = vsyncpa [#allocation3], 0 }
   0x2   :  { %9 = vsyncpa [#allocation4], 0  ;;  %s514_s11 = scalar_lea.hbm %s843_s0, 16 }
   0x3   :  { %p515_p0 = scmp.ne.s32.totalorder %s843_s0, %s514_s11  ;;  %p518_p1 = scmp.lt.u32.totalorder %s514_s11, %s843_s0 }
   0x5   :  { %p520_p2 = pnand %p518_p1, %p515_p0 }
   0x7   :  { %523 = shalt.err (!%p520_p2)
}
   0x8   :  { %s574_s16 = smov [#allocation2]   ;;  %s575_s19 = smov [#allocation6]  }
   0x9   :  { %17 = dma.hbm_to_smem %s843_s0, 16, %s574_s16, [#allocation5]  }
   0xa   :  { %s23_s20 = sshll.u32 %s575_s19, 4  ;;  %s524_s23 = scalar_lea.hbm %s844_s1, 384  ;;  %s24_s20 = int_to_ptr.vmem [resolvable:$true] %s23_s20 }
   0xb   :  { %p525_p3 = scmp.ne.s32.totalorder %s844_s1, %s524_s23  ;;  %p528_p4 = scmp.lt.u32.totalorder %s524_s23, %s844_s1 }
   0xd   :  { %p530_p5 = pnand %p528_p4, %p525_p3 }
   0xf   :  { %533 = shalt.err (!%p530_p5)
}
  0x10   :  { %s534_s28 = scalar_lea.vmem %s24_s20, 384  ;;  %p539_p7 = scmp.lt.s32.totalorder %s24_s20, %s24_s20 }
  0x11   :  { %p535_p6 = scmp.ne.s32.totalorder %s24_s20, %s534_s28  ;;  %p540_p8 = scmp.lt.s32.totalorder %s534_s28, %s534_s28 }
  0x13   :  { %p541_p9 = por %p540_p8, %p539_p7 }
  0x15   :  { %p542_p10 = pnand %p541_p9, %p535_p6 }
  0x17   :  { %545 = shalt.err (!%p542_p10)
}
  0x18   :  { %s576_s0 = smov 128   ;;  %s577_s29 = smov 8  }
  0x19   :  { %29 = dma.hbm_to_vmem [thread:$0]  %s844_s1, 384, %s24_s20, [#allocation3], %s576_s0, %s576_s0, %s577_s29  }
  0x1a   :  { %568 = dma.done.wait [#allocation5], 16  }
  0x1b   :  { %569 = vsyncadd [#allocation5], 4294967280 }
  0x1c   :  { %570 = dma.done.wait [#allocation3], 384  }
  0x1d   :  { %571 = vsyncadd [#allocation3], 4294966912 }
  0x1e   :  { %36 = sfence }
  0x1f   :  { %s37_s4 = sld [smem:[#allocation2]]  ;;  %s392_s5 = sld [smem:[#allocation2 + $0x1]]  ;;  %v123_v0 = vld [vmem:[#allocation6] sm:$0xff]  ;;  %v126_v3 = vld [vmem:[#allocation6 + $0x8] sm:$0xff]  ;;  %v129_v10 = vld [vmem:[#allocation6 + $0x10] sm:$0xff] }
  0x20   :  { %s393_s6 = sld [smem:[#allocation2 + $0x2]]  ;;  %s394_s7 = sld [smem:[#allocation2 + $0x3]] }
  0x21   :  { %s395_s8 = sld [smem:[#allocation2 + $0x4]]  ;;  %s396_s9 = sld [smem:[#allocation2 + $0x5]] }
  0x22   :  { %s397_s10 = sld [smem:[#allocation2 + $0x6]]  ;;  %s621_s11 = sld [smem:[#allocation2 + $0x7]] }
  0x23   :  { %s623_s12 = sld [smem:[#allocation2 + $0x8]]  ;;  %s625_s13 = sld [smem:[#allocation2 + $0x9]] }
  0x24   :  { %s627_s14 = sld [smem:[#allocation2 + $0xa]]  ;;  %s629_s1 = sld [smem:[#allocation2 + $0xb]] }
  0x25   :  { %s631_s15 = sld [smem:[#allocation2 + $0xc]]  ;;  %s633_s16 = sld [smem:[#allocation2 + $0xd]]  ;;  %v130_v1 = vstv %s37_s4  ;;  %v141_v2 = vstv %s392_s5 }
  0x26   :  { %s635_s17 = sld [smem:[#allocation2 + $0xe]]  ;;  %s637_s18 = sld [smem:[#allocation2 + $0xf]]  ;;  %v152_v4 = vstv %s393_s6  ;;  %v163_v5 = vstv %s394_s7  ;;  %v131_v6 = vmul.f32 %v130_v1, %v123_v0  ;;  %v142_v8 = vmul.f32 %v141_v2, %v123_v0 }
  0x27   :  { %v134_v7 = vstv %s395_s8  ;;  %v145_v9 = vstv %s396_s9  ;;  %v153_v11 = vmul.f32 %v152_v4, %v123_v0  ;;  %v164_v13 = vmul.f32 %v163_v5, %v123_v0  ;;  %s644_s19 = sld [smem:[#allocation2 + $0x10]]  ;;  %s648_s20 = sld [smem:[#allocation2 + $0x11]] }
  0x28   :  { %v156_v12 = vstv %s397_s10  ;;  %v167_v14 = vstv %s621_s11  ;;  %v135_v15 = vmul.f32 %v134_v7, %v126_v3  ;;  %v146_v17 = vmul.f32 %v145_v9, %v126_v3  ;;  %s650_s21 = sld [smem:[#allocation2 + $0x12]]  ;;  %s654_s22 = sld [smem:[#allocation2 + $0x13]] }
  0x29   :  { %v137_v16 = vstv %s623_s12  ;;  %v148_v18 = vstv %s625_s13  ;;  %v157_v19 = vmul.f32 %v156_v12, %v126_v3  ;;  %v168_v21 = vmul.f32 %v167_v14, %v126_v3  ;;  %s656_s23 = sld [smem:[#allocation2 + $0x14]]  ;;  %s658_s24 = sld [smem:[#allocation2 + $0x15]] }
  0x2a   :  { %v159_v20 = vstv %s627_s14  ;;  %v170_v22 = vstv %s629_s1  ;;  %v138_v24 = vmul.f32 %v137_v16, %v129_v10  ;;  %v149_v26 = vmul.f32 %v148_v18, %v129_v10  ;;  %s660_s25 = sld [smem:[#allocation2 + $0x16]]  ;;  %s662_s26 = sld [smem:[#allocation2 + $0x17]] }
  0x2b   :  { %v132_v23 = vstv %s631_s15  ;;  %v143_v25 = vstv %s633_s16  ;;  %v160_v32 = vmul.f32 %v159_v20, %v129_v10  ;;  %v171_v34 = vmul.f32 %v170_v22, %v129_v10  ;;  %s664_s27 = sld [smem:[#allocation2 + $0x18]]  ;;  %s666_s28 = sld [smem:[#allocation2 + $0x19]] }
  0x2c   :  { %v133_v27 = vadd.f32 %v132_v23, %v131_v6  ;;  %v144_v28 = vadd.f32 %v143_v25, %v142_v8  ;;  %v154_v29 = vstv %s635_s17  ;;  %v165_v30 = vstv %s637_s18  ;;  %s668_s30 = sld [smem:[#allocation2 + $0x1a]]  ;;  %s670_s3 = sld [smem:[#allocation2 + $0x1b]] }
  0x2d   :  { %v155_v31 = vadd.f32 %v154_v29, %v153_v11  ;;  %v166_v33 = vadd.f32 %v165_v30, %v164_v13  ;;  %s672_s4 = sld [smem:[#allocation2 + $0x1c]]  ;;  %s674_s5 = sld [smem:[#allocation2 + $0x1d]]  ;;  %v174_v43 = vstv %s644_s19  ;;  %v188_v44 = vstv %s648_s20 }
  0x2e   :  { %v136_v35 = vadd.f32 %v135_v15, %v133_v27  ;;  %v147_v36 = vadd.f32 %v146_v17, %v144_v28  ;;  %s676_s6 = sld [smem:[#allocation2 + $0x1e]]  ;;  %s678_s7 = sld [smem:[#allocation2 + $0x20]]  ;;  %v202_v45 = vstv %s650_s21  ;;  %v216_v49 = vstv %s654_s22 }
  0x2f   :  { %v158_v37 = vadd.f32 %v157_v19, %v155_v31  ;;  %v169_v38 = vadd.f32 %v168_v21, %v166_v33  ;;  %s680_s8 = sld [smem:[#allocation2 + $0x21]]  ;;  %s682_s9 = sld [smem:[#allocation2 + $0x22]]  ;;  %v178_v46 = vstv %s656_s23  ;;  %v192_v47 = vstv %s658_s24 }
  0x30   :  { %v139_v39 = vadd.f32 %v138_v24, %v136_v35  ;;  %v150_v40 = vadd.f32 %v149_v26, %v147_v36  ;;  %s684_s10 = sld [smem:[#allocation2 + $0x23]]  ;;  %s686_s11 = sld [smem:[#allocation2 + $0x1f]]  ;;  %v206_v48 = vstv %s660_s25  ;;  %v220_v53 = vstv %s662_s26 }
  0x31   :  { %v161_v41 = vadd.f32 %v160_v32, %v158_v37  ;;  %v172_v42 = vadd.f32 %v171_v34, %v169_v38  ;;  %v181_v50 = vstv %s664_s27  ;;  %v195_v51 = vstv %s666_s28  ;;  %s707_s12 = sld [smem:[#allocation2 + $0x24]]  ;;  %s710_s13 = sld [smem:[#allocation2 + $0x25]] }
  0x32   :  { %482 = vtanh.f32 %v139_v39  ;;  %v209_v52 = vstv %s668_s30  ;;  %v223_v57 = vstv %s670_s3  ;;  %s712_s14 = sld [smem:[#allocation2 + $0x26]]  ;;  %s714_s1 = sld [smem:[#allocation2 + $0x27]] }
  0x33   :  { %484 = vtanh.f32 %v150_v40  ;;  %v184_v54 = vstv %s672_s4  ;;  %v198_v55 = vstv %s674_s5  ;;  %s716_s15 = sld [smem:[#allocation2 + $0x28]]  ;;  %s718_s16 = sld [smem:[#allocation2 + $0x29]] }
  0x34   :  { %486 = vtanh.f32 %v161_v41  ;;  %v212_v56 = vstv %s676_s6  ;;  %v176_v59 = vstv %s678_s7  ;;  %s720_s17 = sld [smem:[#allocation2 + $0x2a]]  ;;  %s722_s18 = sld [smem:[#allocation2 + $0x2b]] }
  0x35   :  { %488 = vtanh.f32 %v172_v42  ;;  %v190_v60 = vstv %s680_s8  ;;  %v204_v61 = vstv %s682_s9  ;;  %s724_s19 = sld [smem:[#allocation2 + $0x2c]]  ;;  %s726_s20 = sld [smem:[#allocation2 + $0x2d]] }
  0x36   :  { %v218_v62 = vstv %s684_s10  ;;  %v226_v17 = vstv %s686_s11  ;;  %s728_s21 = sld [smem:[#allocation2 + $0x2e]]  ;;  %s730_s22 = sld [smem:[#allocation2 + $0x2f]] }
  0x37   :  { %s732_s23 = sld [smem:[#allocation2 + $0x30]]  ;;  %s734_s24 = sld [smem:[#allocation2 + $0x31]]  ;;  %v230_v35 = vstv %s707_s12  ;;  %v244_v36 = vstv %s710_s13 }
  0x38   :  { %s736_s25 = sld [smem:[#allocation2 + $0x32]]  ;;  %s738_s26 = sld [smem:[#allocation2 + $0x34]]  ;;  %v258_v37 = vstv %s712_s14  ;;  %v272_v41 = vstv %s714_s1 }
  0x39   :  { %s740_s27 = sld [smem:[#allocation2 + $0x35]]  ;;  %s742_s28 = sld [smem:[#allocation2 + $0x36]]  ;;  %v234_v38 = vstv %s716_s15  ;;  %v248_v39 = vstv %s718_s16 }
  0x3a   :  { %s744_s30 = sld [smem:[#allocation2 + $0x37]]  ;;  %s746_s3 = sld [smem:[#allocation2 + $0x33]]  ;;  %v262_v40 = vstv %s720_s17 }
  0x3b   :  { %v237_v42 = vstv %s724_s19  ;;  %s767_s4 = sld [smem:[#allocation2 + $0x38]]  ;;  %s770_s5 = sld [smem:[#allocation2 + $0x39]] }
  0x3c   :  { %v483_v58 = vpop.eup %482  ;;  %s772_s6 = sld [smem:[#allocation2 + $0x3a]]  ;;  %s774_s7 = sld [smem:[#allocation2 + $0x3b]] }
  0x3d   :  { %v485_v63 = vpop.eup %484  ;;  %v175_v0 = vmul.f32 %v483_v58, %v174_v43  ;;  %v189_v1 = vmul.f32 %v483_v58, %v188_v44  ;;  %v203_v2 = vmul.f32 %v483_v58, %v202_v45  ;;  %v217_v3 = vmul.f32 %v483_v58, %v216_v49  ;;  %s776_s8 = sld [smem:[#allocation2 + $0x3c]]  ;;  %s778_s9 = sld [smem:[#allocation2 + $0x3d]] }
  0x3e   :  { %v487_v4 = vpop.eup %486  ;;  %v179_v5 = vmul.f32 %v485_v63, %v178_v46  ;;  %v193_v6 = vmul.f32 %v485_v63, %v192_v47  ;;  %v207_v7 = vmul.f32 %v485_v63, %v206_v48  ;;  %v221_v8 = vmul.f32 %v485_v63, %v220_v53  ;;  %s780_s10 = sld [smem:[#allocation2 + $0x3e]]  ;;  %s782_s11 = sld [smem:[#allocation2 + $0x3f]] }
  0x3f   :  { %v489_v9 = vpop.eup %488  ;;  %v177_v10 = vadd.f32 %v176_v59, %v175_v0  ;;  %v182_v11 = vmul.f32 %v487_v4, %v181_v50  ;;  %v191_v12 = vadd.f32 %v190_v60, %v189_v1  ;;  %v196_v13 = vmul.f32 %v487_v4, %v195_v51  ;;  %s784_s12 = sld [smem:[#allocation2 + $0x40]]  ;;  %s786_s13 = sld [smem:[#allocation2 + $0x41]] }
  0x40   :  { %v185_v14 = vmul.f32 %v489_v9, %v184_v54  ;;  %v205_v15 = vadd.f32 %v204_v61, %v203_v2  ;;  %v210_v16 = vmul.f32 %v487_v4, %v209_v52  ;;  %v199_v20 = vmul.f32 %v489_v9, %v198_v55  ;;  %s788_s14 = sld [smem:[#allocation2 + $0x42]]  ;;  %s790_s1 = sld [smem:[#allocation2 + $0x44]] }
  0x41   :  { %v180_v18 = vadd.f32 %v179_v5, %v177_v10  ;;  %v194_v19 = vadd.f32 %v193_v6, %v191_v12  ;;  %v219_v21 = vadd.f32 %v218_v62, %v217_v3  ;;  %v213_v23 = vmul.f32 %v489_v9, %v212_v56  ;;  %s792_s15 = sld [smem:[#allocation2 + $0x48]]  ;;  %s794_s16 = sld [smem:[#allocation2 + $0x43]] }
  0x42   :  { %v208_v22 = vadd.f32 %v207_v7, %v205_v15  ;;  %v224_v24 = vmul.f32 %v487_v4, %v223_v57  ;;  %v227_v28 = vmul.f32 %v489_v9, %v226_v17  ;;  %v251_v43 = vstv %s726_s20  ;;  %s796_s17 = sld [smem:[#allocation2 + $0x49]]  ;;  %s800_s19 = sld [smem:[#allocation2 + $0x4a]] }
  0x43   :  { %v183_v25 = vadd.f32 %v182_v11, %v180_v18  ;;  %v197_v26 = vadd.f32 %v196_v13, %v194_v19  ;;  %v222_v27 = vadd.f32 %v221_v8, %v219_v21  ;;  %v265_v44 = vstv %s728_s21  ;;  %s802_s20 = sld [smem:[#allocation2 + $0x46]]  ;;  %s804_s21 = sld [smem:[#allocation2 + $0x4b]] }
  0x44   :  { %v211_v29 = vadd.f32 %v210_v16, %v208_v22  ;;  %v276_v45 = vstv %s722_s18  ;;  %v232_v46 = vstv %s738_s26  ;;  %v240_v47 = vstv %s732_s23  ;;  %s798_s18 = sld [smem:[#allocation2 + $0x45]]  ;;  %s467_s23 = sld [smem:[#allocation2 + $0x4c]] }
  0x45   :  { %v186_v30 = vadd.f32 %v185_v14, %v183_v25  ;;  %v200_v31 = vadd.f32 %v199_v20, %v197_v26  ;;  %v225_v32 = vadd.f32 %v224_v24, %v222_v27  ;;  %v246_v48 = vstv %s740_s27  ;;  %s470_s26 = sld [smem:[#allocation2 + $0x4f]]  ;;  %s471_s27 = sld [smem:[#allocation2 + $0x50]] }
  0x46   :  { %v214_v33 = vadd.f32 %v213_v23, %v211_v29  ;;  %v279_v49 = vstv %s730_s22  ;;  %v254_v51 = vstv %s734_s24  ;;  %v260_v52 = vstv %s742_s28  ;;  %s806_s22 = sld [smem:[#allocation2 + $0x47]]  ;;  %s468_s24 = sld [smem:[#allocation2 + $0x4d]] }
  0x47   :  { %490 = vtanh.f32 %v186_v30  ;;  %v228_v34 = vadd.f32 %v227_v28, %v225_v32  ;;  %v268_v53 = vstv %s736_s25  ;;  %v274_v54 = vstv %s744_s30  ;;  %s469_s25 = sld [smem:[#allocation2 + $0x4e]]  ;;  %s472_s28 = sld [smem:[#allocation2 + $0x51]] }
  0x48   :  { %492 = vtanh.f32 %v200_v31  ;;  %v282_v9 = vstv %s746_s3  ;;  %v286_v27 = vstv %s767_s4  ;;  %v290_v28 = vstv %s776_s8  ;;  %s475_s30 = sld [smem:[#allocation2 + $0x54]]  ;;  %s476_s3 = sld [smem:[#allocation2 + $0x55]] }
  0x49   :  { %494 = vtanh.f32 %v214_v33  ;;  %v293_v29 = vstv %s784_s12  ;;  %v288_v30 = vstv %s792_s15  ;;  %v296_v31 = vstv %s790_s1  ;;  %s473_s4 = sld [smem:[#allocation2 + $0x52]] }
  0x4a   :  { %496 = vtanh.f32 %v228_v34  ;;  %v300_v32 = vstv %s770_s5  ;;  %v304_v33 = vstv %s778_s9  ;;  %v302_v34 = vstv %s796_s17  ;;  %s474_s5 = sld [smem:[#allocation2 + $0x53]] }
  0x51   :  { %v491_v50 = vpop.eup %490 }
  0x52   :  { %v493_v55 = vpop.eup %492  ;;  %v231_v56 = vmul.f32 %v491_v50, %v230_v35  ;;  %v245_v57 = vmul.f32 %v491_v50, %v244_v36  ;;  %v259_v58 = vmul.f32 %v491_v50, %v258_v37  ;;  %v273_v59 = vmul.f32 %v491_v50, %v272_v41 }
  0x53   :  { %v495_v60 = vpop.eup %494  ;;  %v235_v61 = vmul.f32 %v493_v55, %v234_v38  ;;  %v249_v62 = vmul.f32 %v493_v55, %v248_v39  ;;  %v263_v63 = vmul.f32 %v493_v55, %v262_v40  ;;  %v277_v0 = vmul.f32 %v493_v55, %v276_v45 }
  0x54   :  { %v497_v1 = vpop.eup %496  ;;  %v233_v2 = vadd.f32 %v232_v46, %v231_v56  ;;  %v238_v3 = vmul.f32 %v495_v60, %v237_v42  ;;  %v247_v4 = vadd.f32 %v246_v48, %v245_v57  ;;  %v252_v5 = vmul.f32 %v495_v60, %v251_v43 }
  0x55   :  { %v241_v6 = vmul.f32 %v497_v1, %v240_v47  ;;  %v261_v7 = vadd.f32 %v260_v52, %v259_v58  ;;  %v266_v8 = vmul.f32 %v495_v60, %v265_v44  ;;  %v255_v12 = vmul.f32 %v497_v1, %v254_v51 }
  0x56   :  { %v236_v10 = vadd.f32 %v235_v61, %v233_v2  ;;  %v250_v11 = vadd.f32 %v249_v62, %v247_v4  ;;  %v275_v13 = vadd.f32 %v274_v54, %v273_v59  ;;  %v269_v15 = vmul.f32 %v497_v1, %v268_v53 }
  0x57   :  { %v264_v14 = vadd.f32 %v263_v63, %v261_v7  ;;  %v280_v16 = vmul.f32 %v495_v60, %v279_v49  ;;  %v283_v20 = vmul.f32 %v497_v1, %v282_v9  ;;  %v307_v35 = vstv %s786_s13 }
  0x58   :  { %v239_v17 = vadd.f32 %v238_v3, %v236_v10  ;;  %v253_v18 = vadd.f32 %v252_v5, %v250_v11  ;;  %v278_v19 = vadd.f32 %v277_v0, %v275_v13  ;;  %v314_v36 = vstv %s772_s6  ;;  %s578_s6 = smov [#allocation7]  }
  0x59   :  { %v267_v21 = vadd.f32 %v266_v8, %v264_v14  ;;  %v328_v37 = vstv %s774_s7  ;;  %v310_v38 = vstv %s798_s18  ;;  %v316_v39 = vstv %s800_s19  ;;  %s376_s7 = sshll.u32 %s578_s6, 4  ;;  %s377_s7 = int_to_ptr.vmem [resolvable:$true] %s376_s7 }
  0x5a   :  { %v242_v22 = vadd.f32 %v241_v6, %v239_v17  ;;  %v256_v23 = vadd.f32 %v255_v12, %v253_v18  ;;  %v281_v24 = vadd.f32 %v280_v16, %v278_v19  ;;  %v318_v40 = vstv %s780_s10  ;;  %s546_s8 = scalar_lea.vmem %s377_s7, 256  ;;  %p551_p12 = scmp.lt.s32.totalorder %s377_s7, %s377_s7 }
  0x5b   :  { %v270_v25 = vadd.f32 %v269_v15, %v267_v21  ;;  %v332_v41 = vstv %s782_s11  ;;  %v321_v43 = vstv %s788_s14  ;;  %v324_v44 = vstv %s802_s20  ;;  %p547_p11 = scmp.ne.s32.totalorder %s377_s7, %s546_s8  ;;  %p552_p13 = scmp.lt.s32.totalorder %s546_s8, %s546_s8 }
  0x5c   :  { %498 = vtanh.f32 %v242_v22  ;;  %v284_v26 = vadd.f32 %v283_v20, %v281_v24  ;;  %v330_v45 = vstv %s804_s21  ;;  %v335_v46 = vstv %s794_s16 }
  0x5d   :  { %500 = vtanh.f32 %v256_v23  ;;  %v338_v1 = vstv %s806_s22  ;;  %v342_v19 = vstv %s467_s23  ;;  %v355_v20 = vstv %s468_s24  ;;  %p553_p0 = por %p552_p13, %p551_p12 }
  0x5e   :  { %502 = vtanh.f32 %v270_v25  ;;  %v346_v21 = vstv %s469_s25  ;;  %v359_v22 = vstv %s470_s26  ;;  %v344_v24 = vstv %s475_s30 }
  0x5f   :  { %504 = vtanh.f32 %v284_v26  ;;  %v349_v25 = vstv %s471_s27  ;;  %v357_v26 = vstv %s476_s3  ;;  %p554_p1 = pnand %p553_p0, %p547_p11 }
  0x66   :  { %v499_v42 = vpop.eup %498 }
  0x67   :  { %v501_v47 = vpop.eup %500  ;;  %v287_v48 = vmul.f32 %v499_v42, %v286_v27  ;;  %v301_v49 = vmul.f32 %v499_v42, %v300_v32  ;;  %v315_v50 = vmul.f32 %v499_v42, %v314_v36  ;;  %v329_v51 = vmul.f32 %v499_v42, %v328_v37 }
  0x68   :  { %v503_v52 = vpop.eup %502  ;;  %v291_v53 = vmul.f32 %v501_v47, %v290_v28  ;;  %v305_v54 = vmul.f32 %v501_v47, %v304_v33  ;;  %v319_v55 = vmul.f32 %v501_v47, %v318_v40  ;;  %v333_v56 = vmul.f32 %v501_v47, %v332_v41 }
  0x69   :  { %v505_v57 = vpop.eup %504  ;;  %v289_v58 = vadd.f32 %v288_v30, %v287_v48  ;;  %v294_v59 = vmul.f32 %v503_v52, %v293_v29  ;;  %v303_v60 = vadd.f32 %v302_v34, %v301_v49  ;;  %v308_v61 = vmul.f32 %v503_v52, %v307_v35 }
  0x6a   :  { %v297_v62 = vmul.f32 %v505_v57, %v296_v31  ;;  %v317_v63 = vadd.f32 %v316_v39, %v315_v50  ;;  %v322_v0 = vmul.f32 %v503_v52, %v321_v43  ;;  %v311_v4 = vmul.f32 %v505_v57, %v310_v38 }
  0x6b   :  { %v292_v2 = vadd.f32 %v291_v53, %v289_v58  ;;  %v306_v3 = vadd.f32 %v305_v54, %v303_v60  ;;  %v331_v5 = vadd.f32 %v330_v45, %v329_v51  ;;  %v325_v7 = vmul.f32 %v505_v57, %v324_v44 }
  0x6c   :  { %v320_v6 = vadd.f32 %v319_v55, %v317_v63  ;;  %v336_v8 = vmul.f32 %v503_v52, %v335_v46  ;;  %v339_v12 = vmul.f32 %v505_v57, %v338_v1  ;;  %v362_v27 = vstv %s472_s28 }
  0x6d   :  { %v295_v9 = vadd.f32 %v294_v59, %v292_v2  ;;  %v309_v10 = vadd.f32 %v308_v61, %v306_v3  ;;  %v334_v11 = vadd.f32 %v333_v56, %v331_v5  ;;  %v352_v33 = vstv %s473_s4 }
  0x6e   :  { %v323_v13 = vadd.f32 %v322_v0, %v320_v6  ;;  %v365_v35 = vstv %s474_s5 }
  0x6f   :  { %v298_v14 = vadd.f32 %v297_v62, %v295_v9  ;;  %v312_v15 = vadd.f32 %v311_v4, %v309_v10  ;;  %v337_v16 = vadd.f32 %v336_v8, %v334_v11 }
  0x70   :  { %v326_v17 = vadd.f32 %v325_v7, %v323_v13 }
  0x71   :  { %506 = vtanh.f32 %v298_v14  ;;  %v340_v18 = vadd.f32 %v339_v12, %v337_v16 }
  0x72   :  { %508 = vtanh.f32 %v312_v15 }
  0x73   :  { %510 = vtanh.f32 %v326_v17 }
  0x74   :  { %512 = vtanh.f32 %v340_v18 }
  0x7b   :  { %v507_v23 = vpop.eup %506 }
  0x7c   :  { %v509_v28 = vpop.eup %508  ;;  %v343_v29 = vmul.f32 %v507_v23, %v342_v19  ;;  %v356_v30 = vmul.f32 %v507_v23, %v355_v20 }
  0x7d   :  { %v511_v31 = vpop.eup %510  ;;  %v347_v32 = vmul.f32 %v509_v28, %v346_v21  ;;  %v360_v34 = vmul.f32 %v509_v28, %v359_v22 }
  0x7e   :  { %v513_v36 = vpop.eup %512  ;;  %v345_v37 = vadd.f32 %v344_v24, %v343_v29  ;;  %v350_v38 = vmul.f32 %v511_v31, %v349_v25  ;;  %v358_v39 = vadd.f32 %v357_v26, %v356_v30  ;;  %v363_v40 = vmul.f32 %v511_v31, %v362_v27 }
  0x7f   :  { %v353_v42 = vmul.f32 %v513_v36, %v352_v33  ;;  %v366_v44 = vmul.f32 %v513_v36, %v365_v35 }
  0x80   :  { %v348_v41 = vadd.f32 %v347_v32, %v345_v37  ;;  %v361_v43 = vadd.f32 %v360_v34, %v358_v39 }
  0x82   :  { %v351_v45 = vadd.f32 %v350_v38, %v348_v41  ;;  %v364_v46 = vadd.f32 %v363_v40, %v361_v43 }
  0x84   :  { %v354_v47 = vadd.f32 %v353_v42, %v351_v45  ;;  %v367_v48 = vadd.f32 %v366_v44, %v364_v46 }
  0x86   :  { %368 = vst [vmem:[#allocation7] sm:$0xff] %v354_v47  ;;  %370 = vst [vmem:[#allocation7 + $0x8] sm:$0xff] %v367_v48 }
  0x87   :  { %557 = shalt.err (!%p554_p1)
}
  0x88   :  { %s558_s11 = scalar_lea.hbm %s845_s2, 256 }
  0x89   :  { %p559_p2 = scmp.ne.s32.totalorder %s845_s2, %s558_s11  ;;  %p562_p3 = scmp.lt.u32.totalorder %s558_s11, %s845_s2 }
  0x8b   :  { %p564_p4 = pnand %p562_p3, %p559_p2 }
  0x8d   :  { %567 = shalt.err (!%p564_p4)
}
  0x8e   :  { %382 = dma.vmem_to_hbm [thread:$0]  %s377_s7, 256, %s845_s2, [#allocation4], %s576_s0, %s576_s0, %s577_s29  }
  0x8f   :  { %572 = dma.done.wait [#allocation4], 256  }
  0x90   :  { %573 = vsyncadd [#allocation4], 4294967040 }
  0x91   :  { %386 = vsyncpa [#allocation3], 1 }
  0x92   :  { %387 = vsyncpa [#allocation4], 1 }
  0x93   :  { %388 = vsyncpa [#allocation5], 1 }

</bundles_post_ra>
